<compile_context>
chip_gen: v7x
topology: tpu7x:2x2x1
jax: 0.10.0
libtpu: 0.0.40
codegen_flags: <defaults>
</compile_context>

<pallas_src>
import jax
import jax.numpy as jnp
from jax.experimental import pallas as pl
from jax.experimental.pallas import tpu as pltpu


def _round_up(x, m):
    return (x + m - 1) // m * m


def _pick_tb(B):
    """Batch tile size: sublane-aligned single step at small B; otherwise the
    fewest >=2 steps of a 128-multiple tile, capped at 2048 rows (keeps
    padding below steps*128 rows instead of a near-2x blowup)."""
    B = max(B, 1)
    if B <= 512:
        return _round_up(B, 8)
    steps = max(2, -(-B // 2048))            # >=2 steps so v7x megacore shards
    return min(2048, _round_up(-(-B // steps), 128))


def _mlp_kernel(x_ref, w1_ref, b1_ref, w2_ref, b2_ref, o_ref):
    # Layer 1: single fused K = F1+F2 matmul (bf16 in, f32 accumulate).
    h = jnp.dot(x_ref[...], w1_ref[...], preferred_element_type=jnp.float32)
    # Bias + ReLU in f32 (keep elementwise work off bf16 for v5e's VPU).
    h = jnp.maximum(h + b1_ref[...], 0.0)
    # Layer 2: bf16 in, f32 accumulate, then bias.
    z = jnp.dot(h.astype(w2_ref.dtype), w2_ref[...],
                preferred_element_type=jnp.float32)
    z = z + b2_ref[...]
    # Sigmoid = 1 / (1 + exp(-z)); exp + approx reciprocal stay on the EUP.
    o_ref[...] = pl.reciprocal(1.0 + jnp.exp(-z), approx=True).astype(o_ref.dtype)


def concat_classifier_forward(x1, x2, params, classes):
    """x1: [B, F1], x2: [B, F2]. Returns sigmoid probabilities [B, classes] (f32)."""
    w1, b1, w2, b2 = params
    B = x1.shape[0]
    F = w1.shape[0]            # F1 + F2
    H = w1.shape[1]            # 512
    Cp = w2.shape[1]           # lane-padded classifier dim (multiple of 128)

    # Concat + cast to bf16 once in the wrapper (input bytes halve; kernel
    # math is bf16-in / f32-acc regardless).
    x = jnp.concatenate([x1, x2], axis=1).astype(jnp.bfloat16)

    TB = _pick_tb(B)
    Bp = _round_up(B, TB)
    if Bp != B:
        x = jnp.pad(x, ((0, Bp - B), (0, 0)))
    grid = (Bp // TB,)

    flops = 2 * Bp * F * H + 2 * Bp * H * Cp
    bytes_accessed = (
        Bp * F * 2                                           # bf16 activations in
        + sum(int(p.size) * p.dtype.itemsize for p in params)
        + Bp * Cp * 2)                                       # bf16 output
    cost = pl.CostEstimate(flops=flops, transcendentals=2 * Bp * Cp,
                           bytes_accessed=bytes_accessed)

    cp_kwargs = dict(dimension_semantics=("parallel",))
    if TB > 1024:
        # Big-tile path: raise v5e's 16 MiB default scoped VMEM; still well
        # under v7x's 32 MiB default / 64 MiB physical.
        cp_kwargs["vmem_limit_bytes"] = 32 << 20

    out = pl.pallas_call(
        _mlp_kernel,
        out_shape=jax.ShapeDtypeStruct((Bp, Cp), jnp.bfloat16),
        grid=grid,
        in_specs=[
            pl.BlockSpec((TB, F), lambda i: (i, 0)),     # fused activation tile
            pl.BlockSpec((F, H), lambda i: (0, 0)),      # weights: VMEM-resident
            pl.BlockSpec((1, H), lambda i: (0, 0)),
            pl.BlockSpec((H, Cp), lambda i: (0, 0)),
            pl.BlockSpec((1, Cp), lambda i: (0, 0)),
        ],
        out_specs=pl.BlockSpec((TB, Cp), lambda i: (i, 0)),
        compiler_params=pltpu.CompilerParams(**cp_kwargs),
        cost_estimate=cost,
    )(x, w1, b1, w2, b2)

    # Slice off padded rows / padded class lanes, then upcast to f32.
    return out[:B, :classes].astype(jnp.float32)


def init_params(key, f1, f2, hidden, classes,
                weight_dtype=jnp.bfloat16, lane=128):
    """nn.Linear-style init U(-1/sqrt(fan_in), 1/sqrt(fan_in)); weights cast to
    bf16 (native MXU input), classifier dim zero-padded to a lane multiple."""
    in_features = f1 + f2
    k1, k2, k3, k4 = jax.random.split(key, 4)
    bound1 = 1.0 / (in_features ** 0.5)
    bound2 = 1.0 / (hidden ** 0.5)
    w1 = jax.random.uniform(k1, (in_features, hidden), jnp.float32, -bound1, bound1)
    b1 = jax.random.uniform(k2, (1, hidden), jnp.float32, -bound1, bound1)
    w2 = jax.random.uniform(k3, (hidden, classes), jnp.float32, -bound2, bound2)
    b2 = jax.random.uniform(k4, (1, classes), jnp.float32, -bound2, bound2)

    c_pad = _round_up(classes, lane)
    w2p = jnp.zeros((hidden, c_pad), weight_dtype).at[:, :classes].set(
        w2.astype(weight_dtype))
    b2p = jnp.zeros((1, c_pad), jnp.float32).at[:, :classes].set(b2)
    return (w1.astype(weight_dtype), b1, w2p, b2p)


if __name__ == "__main__":
    # Small shapes consistent with the module: two feature vectors per sample.
    B = 8          # batch
    F1 = 24        # input_shape1[1]
    F2 = 40        # input_shape2[1]
    HIDDEN = 512   # fixed by the module
    CLASSES = 10

    key = jax.random.PRNGKey(0)
    kx1, kx2, kp = jax.random.split(key, 3)
    x1 = jax.random.normal(kx1, (B, F1), jnp.float32)
    x2 = jax.random.normal(kx2, (B, F2), jnp.float32)
    params = init_params(kp, F1, F2, HIDDEN, CLASSES)

    out = concat_classifier_forward(x1, x2, params, CLASSES)
    out = jax.block_until_ready(out)

    # Pure-JAX reference of the same math (bf16 matmul inputs, f32 accumulate).
    w1, b1, w2p, b2p = params
    x_bf = jnp.concatenate([x1, x2], axis=1).astype(jnp.bfloat16)
    h_ref = jnp.maximum(
        jnp.dot(x_bf, w1, preferred_element_type=jnp.float32) + b1, 0.0)
    z_ref = jnp.dot(h_ref.astype(jnp.bfloat16), w2p,
                    preferred_element_type=jnp.float32) + b2p
    ref = jax.nn.sigmoid(z_ref)[:, :CLASSES]

    assert out.shape == (B, CLASSES)
    # bf16 output + approx reciprocal in the sigmoid -> ~1e-2 tolerance.
    assert jnp.allclose(out, ref, atol=1e-2, rtol=1e-2)

    print("KERNEL_OK")
</pallas_src>

<mosaic_0001>
module attributes {stable_mosaic.version = 11 : i64} {
  func.func @_mlp_kernel(%arg0: i32, %arg1: memref<8x64xbf16, #tpu.memory_space<vmem>>, %arg2: memref<64x512xbf16, #tpu.memory_space<vmem>>, %arg3: memref<1x512xf32, #tpu.memory_space<vmem>>, %arg4: memref<512x128xbf16, #tpu.memory_space<vmem>>, %arg5: memref<1x128xf32, #tpu.memory_space<vmem>>, %arg6: memref<8x128xbf16, #tpu.memory_space<vmem>>) attributes {dimension_semantics = [#tpu.dimension_semantics<parallel>], iteration_bounds = array<i64: 1>, scalar_prefetch = 0 : i64, scratch_operands = 0 : i64, tpu.core_type = #tpu.core_type<tc>, window_params = [{transform_indices = @transform_0, window_bounds = array<i64: 8, 64>}, {pipeline_mode = #tpu.pipeline_mode<synchronous>, transform_indices = @transform_1, window_bounds = array<i64: 64, 512>}, {pipeline_mode = #tpu.pipeline_mode<synchronous>, transform_indices = @transform_2, window_bounds = array<i64: 1, 512>}, {pipeline_mode = #tpu.pipeline_mode<synchronous>, transform_indices = @transform_3, window_bounds = array<i64: 512, 128>}, {pipeline_mode = #tpu.pipeline_mode<synchronous>, transform_indices = @transform_4, window_bounds = array<i64: 1, 128>}, {transform_indices = @transform_5, window_bounds = array<i64: 8, 128>}]} {
    %c0 = arith.constant 0 : index
    %c0_0 = arith.constant 0 : index
    %0 = vector.load %arg1[%c0, %c0_0] : memref<8x64xbf16, #tpu.memory_space<vmem>>, vector<8x64xbf16>
    %c0_1 = arith.constant 0 : index
    %c0_2 = arith.constant 0 : index
    %1 = vector.load %arg2[%c0_1, %c0_2] : memref<64x512xbf16, #tpu.memory_space<vmem>>, vector<64x512xbf16>
    %cst = arith.constant dense<0.000000e+00> : vector<8x512xf32>
    %2 = tpu.matmul %0, %1, %cst {dimension_numbers = #tpu.dot_dimension_numbers<[1], [0], [0], [1], [0, 0, 1, 1], [], []>} : vector<8x64xbf16>, vector<64x512xbf16>, vector<8x512xf32> -> vector<8x512xf32>
    %c0_3 = arith.constant 0 : index
    %c0_4 = arith.constant 0 : index
    %3 = vector.load %arg3[%c0_3, %c0_4] : memref<1x512xf32, #tpu.memory_space<vmem>>, vector<1x512xf32>
    %4 = vector.broadcast %3 : vector<1x512xf32> to vector<8x512xf32>
    %5 = arith.addf %2, %4 : vector<8x512xf32>
    %cst_5 = arith.constant 0.000000e+00 : f32
    %6 = vector.broadcast %cst_5 : f32 to vector<8x512xf32>
    %7 = arith.maximumf %5, %6 : vector<8x512xf32>
    %8 = arith.truncf %7 : vector<8x512xf32> to vector<8x512xbf16>
    %c0_6 = arith.constant 0 : index
    %c0_7 = arith.constant 0 : index
    %9 = vector.load %arg4[%c0_6, %c0_7] : memref<512x128xbf16, #tpu.memory_space<vmem>>, vector<512x128xbf16>
    %cst_8 = arith.constant dense<0.000000e+00> : vector<8x128xf32>
    %10 = tpu.matmul %8, %9, %cst_8 {dimension_numbers = #tpu.dot_dimension_numbers<[1], [0], [0], [1], [0, 0, 1, 1], [], []>} : vector<8x512xbf16>, vector<512x128xbf16>, vector<8x128xf32> -> vector<8x128xf32>
    %c0_9 = arith.constant 0 : index
    %c0_10 = arith.constant 0 : index
    %11 = vector.load %arg5[%c0_9, %c0_10] : memref<1x128xf32, #tpu.memory_space<vmem>>, vector<1x128xf32>
    %12 = vector.broadcast %11 : vector<1x128xf32> to vector<8x128xf32>
    %13 = arith.addf %10, %12 : vector<8x128xf32>
    %cst_11 = arith.constant 0.000000e+00 : f32
    %14 = vector.broadcast %cst_11 : f32 to vector<8x128xf32>
    %15 = arith.subf %14, %13 : vector<8x128xf32>
    %16 = math.exp %15 : vector<8x128xf32>
    %cst_12 = arith.constant 1.000000e+00 : f32
    %17 = vector.broadcast %cst_12 : f32 to vector<8x128xf32>
    %18 = arith.addf %17, %16 : vector<8x128xf32>
    %19 = tpu.reciprocal %18 {approx = true} : vector<8x128xf32> -> vector<8x128xf32>
    %20 = arith.truncf %19 : vector<8x128xf32> to vector<8x128xbf16>
    %c0_13 = arith.constant 0 : index
    %c0_14 = arith.constant 0 : index
    %21 = vector.load %arg6[%c0_13, %c0_14] : memref<8x128xbf16, #tpu.memory_space<vmem>>, vector<8x128xbf16>
    tpu.vector_store %arg6[%c0_13, %c0_14], %20 {strides = array<i32>} : memref<8x128xbf16, #tpu.memory_space<vmem>>, vector<8x128xbf16>,
    return
  }
  func.func @transform_0(%arg0: i32) -> (i32, i32) {
    %c0_i32 = arith.constant 0 : i32
    %c0_i32_0 = arith.constant 0 : i32
    return %arg0, %c0_i32 : i32, i32
  }
  func.func @transform_1(%arg0: i32) -> (i32, i32) {
    %c0_i32 = arith.constant 0 : i32
    %c0_i32_0 = arith.constant 0 : i32
    %c0_i32_1 = arith.constant 0 : i32
    return %c0_i32, %c0_i32_0 : i32, i32
  }
  func.func @transform_2(%arg0: i32) -> (i32, i32) {
    %c0_i32 = arith.constant 0 : i32
    %c0_i32_0 = arith.constant 0 : i32
    %c0_i32_1 = arith.constant 0 : i32
    return %c0_i32, %c0_i32_0 : i32, i32
  }
  func.func @transform_3(%arg0: i32) -> (i32, i32) {
    %c0_i32 = arith.constant 0 : i32
    %c0_i32_0 = arith.constant 0 : i32
    %c0_i32_1 = arith.constant 0 : i32
    return %c0_i32, %c0_i32_0 : i32, i32
  }
  func.func @transform_4(%arg0: i32) -> (i32, i32) {
    %c0_i32 = arith.constant 0 : i32
    %c0_i32_0 = arith.constant 0 : i32
    %c0_i32_1 = arith.constant 0 : i32
    return %c0_i32, %c0_i32_0 : i32, i32
  }
  func.func @transform_5(%arg0: i32) -> (i32, i32) {
    %c0_i32 = arith.constant 0 : i32
    %c0_i32_0 = arith.constant 0 : i32
    return %arg0, %c0_i32 : i32, i32
  }
}

</mosaic_0001>

<bundles_post_ra>
// kernel: tpu_custom_call.1
= control target key start
LH: loop header
LB: loop body
LE: loop exit
PB: predicated region body
PF: predicated region fallthrough
CT: control target
= control target key end

     0   :  { %10 = vsyncpa [#allocation3], 0  ;;  %s991_s0 = inlined_call_operand.hbm [shape: bf16[8,64], index: 0, kind: input, shape index: {}]   ;;  %s992_s1 = inlined_call_operand.hbm [shape: bf16[64,512], index: 1, kind: input, shape index: {}]   ;;  %s993_s2 = inlined_call_operand.vmem [shape: f32[1,512], index: 2, kind: input, shape index: {}]   ;;  %s994_s3 = inlined_call_operand.hbm [shape: bf16[512,128], index: 3, kind: input, shape index: {}]   ;;  %s995_s4 = inlined_call_operand.vmem [shape: f32[1,128], index: 4, kind: input, shape index: {}]   ;;  %s996_s5 = inlined_call_operand.hbm [shape: bf16[8,128], index: 5, kind: output, shape index: {}]  }
   0x1   :  { %11 = vsyncpa [#allocation6], 0 }
   0x2   :  { %12 = vsyncpa [#allocation4], 0  ;;  %s898_s18 = smov [#allocation5]   ;;  %s804_s22 = scalar_lea.hbm %s992_s1, 2048 }
   0x3   :  { %s28_s19 = sshll.u32 %s898_s18, 4  ;;  %p805_p0 = scmp.ne.s32.totalorder %s992_s1, %s804_s22  ;;  %s29_s19 = int_to_ptr.vmem [resolvable:$true] %s28_s19 }
   0x4   :  { %p808_p1 = scmp.lt.u32.totalorder %s804_s22, %s992_s1 }
   0x6   :  { %p810_p2 = pnand %p808_p1, %p805_p0 }
   0x8   :  { %813 = shalt.err (!%p810_p2)
}
   0x9   :  { %s814_s27 = scalar_lea.vmem %s29_s19, 2048  ;;  %p819_p4 = scmp.lt.s32.totalorder %s29_s19, %s29_s19 }
   0xa   :  { %p815_p3 = scmp.ne.s32.totalorder %s29_s19, %s814_s27  ;;  %p820_p5 = scmp.lt.s32.totalorder %s814_s27, %s814_s27 }
   0xc   :  { %p821_p6 = por %p820_p5, %p819_p4 }
   0xe   :  { %p822_p7 = pnand %p821_p6, %p815_p3 }
  0x10   :  { %825 = shalt.err (!%p822_p7)
}
  0x11   :  { %s899_s28 = smov 256   ;;  %s900_s29 = smov 16  }
  0x12   :  { %34 = dma.hbm_to_vmem [thread:$0]  %s992_s1, 2048, %s29_s19, [#allocation6], %s899_s28, %s899_s28, %s900_s29  }
  0x13   :  { %s901_s7 = smov [#allocation2]   ;;  %s902_s9 = smov [#allocation7]  }
  0x14   :  { %s19_s8 = sshll.u32 %s901_s7, 4  ;;  %s42_s10 = sshll.u32 %s902_s9, 4  ;;  %s20_s8 = int_to_ptr.vmem [resolvable:$true] %s19_s8  ;;  %s43_s10 = int_to_ptr.vmem [resolvable:$true] %s42_s10 }
  0x15   :  { %s826_s13 = scalar_lea.hbm %s991_s0, 64 }
  0x16   :  { %p827_p8 = scmp.ne.s32.totalorder %s991_s0, %s826_s13  ;;  %p830_p9 = scmp.lt.u32.totalorder %s826_s13, %s991_s0 }
  0x18   :  { %p832_p10 = pnand %p830_p9, %p827_p8 }
  0x1a   :  { %835 = shalt.err (!%p832_p10)
}
  0x1b   :  { %s836_s1 = scalar_lea.vmem %s20_s8, 64  ;;  %p841_p12 = scmp.lt.s32.totalorder %s20_s8, %s20_s8 }
  0x1c   :  { %p837_p11 = scmp.ne.s32.totalorder %s20_s8, %s836_s1  ;;  %p842_p13 = scmp.lt.s32.totalorder %s836_s1, %s836_s1 }
  0x1e   :  { %p843_p0 = por %p842_p13, %p841_p12 }
  0x20   :  { %p844_p1 = pnand %p843_p0, %p837_p11 }
  0x22   :  { %847 = shalt.err (!%p844_p1)
}
  0x23   :  { %22 = dma.hbm_to_vmem [thread:$0]  %s991_s0, 64, %s20_s8, [#allocation3]  }
  0x24   :  { %s848_s22 = scalar_lea.hbm %s994_s3, 4096 }
  0x25   :  { %p849_p2 = scmp.ne.s32.totalorder %s994_s3, %s848_s22  ;;  %p852_p3 = scmp.lt.u32.totalorder %s848_s22, %s994_s3 }
  0x27   :  { %p854_p4 = pnand %p852_p3, %p849_p2 }
  0x29   :  { %857 = shalt.err (!%p854_p4)
}
  0x2a   :  { %s858_s27 = scalar_lea.vmem %s43_s10, 4096  ;;  %p863_p6 = scmp.lt.s32.totalorder %s43_s10, %s43_s10 }
  0x2b   :  { %p859_p5 = scmp.ne.s32.totalorder %s43_s10, %s858_s27  ;;  %p864_p7 = scmp.lt.s32.totalorder %s858_s27, %s858_s27 }
  0x2d   :  { %p865_p8 = por %p864_p7, %p863_p6 }
  0x2f   :  { %p866_p9 = pnand %p865_p8, %p859_p5 }
  0x31   :  { %869 = shalt.err (!%p866_p9)
}
  0x32   :  { %s903_s0 = smov 64   ;;  %s904_s28 = smov 4  }
  0x33   :  { %48 = dma.hbm_to_vmem [thread:$0]  %s994_s3, 4096, %s43_s10, [#allocation6], %s903_s0, %s903_s0, %s904_s28  }
  0x34   :  { %892 = dma.done.wait [#allocation3], 64  }
  0x35   :  { %893 = vsyncadd [#allocation3], 4294967232 }
  0x36   :  { %894 = dma.done.wait [#allocation6], 6144  }
  0x37   :  { %895 = vsyncadd [#allocation6], 4294961152  ;;  %v905_v0 = vmov 0   ;;  %v744_v1 = vld [vmem:[#allocation5 + $0x4] ss:$16 sps:$4 sm:$0xff]   ;;  %vm180_vm0 = vcmask 523264   ;;  %v80_v50 = vlaneseq }
  0x38   :  { %216 = vmatprep.mubr.bf16.mxu0 %v905_v0  ;;  %257 = vmatprep.mubr.bf16.mxu1 %v905_v0  ;;  %v746_v2 = vld [vmem:[#allocation5 + $0xc] ss:$16 sps:$4 sm:$0xff]   ;;  %v748_v3 = vld [vmem:[#allocation5] ss:$16 sps:$4 sm:$0xff]   ;;  %v749_v4 = vld [vmem:[#allocation5 + $0x8] ss:$16 sps:$4 sm:$0xff]  }
  0x39   :  { %184 = vmatprep.subr.bf16.mxu0 %v744_v1  ;;  %225 = vmatprep.subr.bf16.mxu1 %v746_v2  ;;  %v750_v5 = vld [vmem:[#allocation5 + $0x24] ss:$16 sps:$4 sm:$0xff]   ;;  %v752_v6 = vld [vmem:[#allocation5 + $0x2c] ss:$16 sps:$4 sm:$0xff]   ;;  %v754_v7 = vld [vmem:[#allocation5 + $0x20] ss:$16 sps:$4 sm:$0xff]  }
  0x3a   :  { %185 = vmatpush1.bf16.msra.mxu0 %v748_v3  ;;  %226 = vmatpush1.bf16.msra.mxu1 %v749_v4  ;;  %v755_v8 = vld [vmem:[#allocation5 + $0x28] ss:$16 sps:$4 sm:$0xff]   ;;  %v756_v9 = vld [vmem:[#allocation5 + $0x44] ss:$16 sps:$4 sm:$0xff]   ;;  %v758_v10 = vld [vmem:[#allocation5 + $0x4c] ss:$16 sps:$4 sm:$0xff]  }
  0x3b   :  { %186 = vmatprep.subr.bf16.mxu0 %v750_v5  ;;  %227 = vmatprep.subr.bf16.mxu1 %v752_v6  ;;  %v760_v11 = vld [vmem:[#allocation5 + $0x40] ss:$16 sps:$4 sm:$0xff]   ;;  %v761_v12 = vld [vmem:[#allocation5 + $0x48] ss:$16 sps:$4 sm:$0xff]   ;;  %v762_v13 = vld [vmem:[#allocation5 + $0x64] ss:$16 sps:$4 sm:$0xff]  }
  0x3c   :  { %v764_v14 = vld [vmem:[#allocation5 + $0x6c] ss:$16 sps:$4 sm:$0xff]   ;;  %v766_v15 = vld [vmem:[#allocation5 + $0x60] ss:$16 sps:$4 sm:$0xff]   ;;  %v767_v16 = vld [vmem:[#allocation5 + $0x68] ss:$16 sps:$4 sm:$0xff]  }
  0x3d   :  { %v768_v17 = vld [vmem:[#allocation7 + $0x40] sm:$0xff]   ;;  %v61_v19 = vld [vmem:[#allocation2] sm:$0xf]  ;;  %v772_v22 = vld [vmem:[#allocation7 + $0x48] sm:$0xff]   ;;  %v81_v51 = vshrl.u32 %v80_v50, 7  ;;  %s906_s8 = smov [#allocation8]  }
  0x3e   :  { %187 = vmatpush1.bf16.msra.mxu0 %v754_v7  ;;  %228 = vmatpush1.bf16.msra.mxu1 %v755_v8  ;;  %v769_v18 = vld [vmem:[#allocation7 + $0xc0] sm:$0xff]   ;;  %v773_v23 = vld [vmem:[#allocation7 + $0xc8] sm:$0xff]   ;;  %v776_v26 = vld [vmem:[#allocation7 + $0x50] sm:$0xff]   ;;  %s630_s9 = sshll.u32 %s906_s8, 4  ;;  %s631_s9 = int_to_ptr.vmem [resolvable:$true] %s630_s9 }
  0x3f   :  { %188 = vmatprep.subr.bf16.mxu0 %v756_v9  ;;  %229 = vmatprep.subr.bf16.mxu1 %v758_v10  ;;  %v770_v20 = vld [vmem:[#allocation7] sm:$0xff]   ;;  %v774_v24 = vld [vmem:[#allocation7 + $0x8] sm:$0xff]   ;;  %v777_v27 = vld [vmem:[#allocation7 + $0xd0] sm:$0xff]   ;;  %v82_v52 = vsub.s32 0, %v81_v51  ;;  %v90_v53 = vsub.s32 2, %v81_v51  ;;  %v86_v55 = vsub.s32 1, %v81_v51  ;;  %p875_p11 = scmp.lt.s32.totalorder %s631_s9, %s631_s9 }
  0x40   :  { %v771_v21 = vld [vmem:[#allocation7 + $0x80] sm:$0xff]   ;;  %v775_v25 = vld [vmem:[#allocation7 + $0x88] sm:$0xff]   ;;  %v778_v28 = vld [vmem:[#allocation7 + $0x10] sm:$0xff]   ;;  %v94_v56 = vsub.s32 3, %v81_v51 }
  0x41   :  { %v779_v29 = vld [vmem:[#allocation7 + $0x90] sm:$0xff]   ;;  %v780_v30 = vld [vmem:[#allocation7 + $0x58] sm:$0xff]   ;;  %v784_v34 = vld [vmem:[#allocation7 + $0x60] sm:$0xff]  }
  0x42   :  { %189 = vmatpush1.bf16.msra.mxu0 %v760_v11  ;;  %230 = vmatpush1.bf16.msra.mxu1 %v761_v12  ;;  %v781_v31 = vld [vmem:[#allocation7 + $0xd8] sm:$0xff]   ;;  %v785_v35 = vld [vmem:[#allocation7 + $0xe0] sm:$0xff]   ;;  %v788_v38 = vld [vmem:[#allocation7 + $0x68] sm:$0xff]  }
  0x43   :  { %190 = vmatprep.subr.bf16.mxu0 %v762_v13  ;;  %231 = vmatprep.subr.bf16.mxu1 %v764_v14  ;;  %v782_v32 = vld [vmem:[#allocation7 + $0x18] sm:$0xff]   ;;  %v786_v36 = vld [vmem:[#allocation7 + $0x20] sm:$0xff]   ;;  %v789_v39 = vld [vmem:[#allocation7 + $0xe8] sm:$0xff]  }
  0x44   :  { %v783_v33 = vld [vmem:[#allocation7 + $0x98] sm:$0xff]   ;;  %v787_v37 = vld [vmem:[#allocation7 + $0xa0] sm:$0xff]   ;;  %v790_v40 = vld [vmem:[#allocation7 + $0x28] sm:$0xff]  }
  0x45   :  { %v791_v41 = vld [vmem:[#allocation7 + $0xa8] sm:$0xff]   ;;  %v792_v42 = vld [vmem:[#allocation7 + $0x70] sm:$0xff]   ;;  %v796_v46 = vld [vmem:[#allocation7 + $0x78] sm:$0xff]  }
  0x46   :  { %191 = vmatpush1.bf16.msra.mxu0 %v766_v15  ;;  %232 = vmatpush1.bf16.msra.mxu1 %v767_v16  ;;  %v793_v43 = vld [vmem:[#allocation7 + $0xf0] sm:$0xff]   ;;  %v797_v47 = vld [vmem:[#allocation7 + $0xf8] sm:$0xff]  }
  0x47   :  { %691 = vmatprep.subr.bf16.mxu0 %v768_v17  ;;  %713 = vmatprep.subr.bf16.mxu1 %v769_v18  ;;  %v794_v44 = vld [vmem:[#allocation7 + $0x30] sm:$0xff]   ;;  %v798_v48 = vld [vmem:[#allocation7 + $0x38] sm:$0xff]  }
  0x48   :  { %v795_v45 = vld [vmem:[#allocation7 + $0xb0] sm:$0xff]   ;;  %v799_v49 = vld [vmem:[#allocation7 + $0xb8] sm:$0xff]  }
  0x49   :  { %656 = vmatmul.mubr.msk.bf16.vlgmr.msra.gmra.mrb[0].mxu0 %vm180_vm0, %v61_v19  ;;  %657 = vmatmul.mubr.msk.bf16.vlgmr.msra.gmra.mrb[0].mxu1 %vm180_vm0, %v61_v19  ;;  %v78_v54 = vld [vmem:[%s993_s2] sm:$0xf] }
  0x4a   :  { %692 = vmatpush3.bf16.msra.mxu0 %v770_v20  ;;  %714 = vmatpush3.bf16.msra.mxu1 %v771_v21  ;;  %v83_v57 = vrot.slane %v78_v54, %v82_v52  ;;  %v91_v58 = vrot.slane %v78_v54, %v90_v53  ;;  %v87_v59 = vrot.slane %v78_v54, %v86_v55  ;;  %v658_v19 = vld [vmem:[%s995_s4] ss:$0 sm:$0xff]  ;;  %s870_s4 = scalar_lea.vmem %s631_s9, 64 }
  0x4b   :  { %693 = vmatprep.subr.bf16.mxu0 %v772_v22  ;;  %715 = vmatprep.subr.bf16.mxu1 %v773_v23  ;;  %v95_v60 = vrot.slane %v78_v54, %v94_v56  ;;  %p871_p10 = scmp.ne.s32.totalorder %s631_s9, %s870_s4  ;;  %p876_p12 = scmp.lt.s32.totalorder %s870_s4, %s870_s4 }
  0x4d   :  { %p877_p13 = por %p876_p12, %p875_p11 }
  0x4e   :  { %694 = vmatpush3.bf16.msra.mxu0 %v774_v24  ;;  %716 = vmatpush3.bf16.msra.mxu1 %v775_v25 }
  0x4f   :  { %695 = vmatprep.subr.bf16.mxu0 %v776_v26  ;;  %717 = vmatprep.subr.bf16.mxu1 %v777_v27  ;;  %p878_p0 = pnand %p877_p13, %p871_p10 }
  0x52   :  { %696 = vmatpush3.bf16.msra.mxu0 %v778_v28  ;;  %718 = vmatpush3.bf16.msra.mxu1 %v779_v29 }
  0x53   :  { %697 = vmatprep.subr.bf16.mxu0 %v780_v30  ;;  %719 = vmatprep.subr.bf16.mxu1 %v781_v31 }
  0x56   :  { %698 = vmatpush3.bf16.msra.mxu0 %v782_v32  ;;  %720 = vmatpush3.bf16.msra.mxu1 %v783_v33 }
  0x57   :  { %699 = vmatprep.subr.bf16.mxu0 %v784_v34  ;;  %721 = vmatprep.subr.bf16.mxu1 %v785_v35 }
  0x5a   :  { %700 = vmatpush3.bf16.msra.mxu0 %v786_v36  ;;  %722 = vmatpush3.bf16.msra.mxu1 %v787_v37 }
  0x5b   :  { %701 = vmatprep.subr.bf16.mxu0 %v788_v38  ;;  %723 = vmatprep.subr.bf16.mxu1 %v789_v39 }
  0x5e   :  { %702 = vmatpush3.bf16.msra.mxu0 %v790_v40  ;;  %724 = vmatpush3.bf16.msra.mxu1 %v791_v41 }
  0x5f   :  { %703 = vmatprep.subr.bf16.mxu0 %v792_v42  ;;  %725 = vmatprep.subr.bf16.mxu1 %v793_v43 }
  0x62   :  { %704 = vmatpush3.bf16.msra.mxu0 %v794_v44  ;;  %726 = vmatpush3.bf16.msra.mxu1 %v795_v45 }
  0x63   :  { %705 = vmatprep.subr.bf16.mxu0 %v796_v46  ;;  %727 = vmatprep.subr.bf16.mxu1 %v797_v47 }
  0x66   :  { %706 = vmatpush3.bf16.msra.mxu0 %v798_v48  ;;  %728 = vmatpush3.bf16.msra.mxu1 %v799_v49 }
 0x11c   :  { %v218_v61 = vpop.f32.mrb[0].mxu0  ;;  %v259_v62 = vpop.f32.mrb[0].mxu1 }
 0x11d   :  { %v219_v63 = vadd.f32 %v218_v61, %v83_v57  ;;  %v260_v0 = vadd.f32 %v259_v62, %v91_v58  ;;  %v220_v1 = vpop.f32.mrb[1].mxu0  ;;  %v261_v2 = vpop.f32.mrb[1].mxu1 }
 0x11e   :  { %v221_v3 = vadd.f32 %v220_v1, %v87_v59  ;;  %v262_v4 = vadd.f32 %v261_v2, %v95_v60  ;;  %v222_v5 = vpop.f32.mrb[2].mxu0  ;;  %v263_v6 = vpop.f32.mrb[2].mxu1 }
 0x11f   :  { %v266_v7 = vmax.f32 %v219_v63, 0.0  ;;  %v268_v8 = vmax.f32 %v260_v0, 0.0  ;;  %v223_v9 = vpop.f32.mrb[3].mxu0  ;;  %v264_v10 = vpop.f32.mrb[3].mxu1 }
 0x120   :  { %v267_v11 = vmax.f32 %v221_v3, 0.0  ;;  %v269_v12 = vmax.f32 %v262_v4, 0.0 }
 0x121   :  { %v272_v13 = vpack.c.bf16 %v268_v8, %v268_v8  ;;  %v270_v16 = vpack.c.bf16 %v266_v7, %v266_v7 }
 0x122   :  { %v271_v14 = vpack.c.bf16 %v267_v11, %v267_v11  ;;  %v273_v15 = vpack.c.bf16 %v269_v12, %v269_v12 }
 0x124   :  { %569 = vmatprep.mubr.bf16.mxu0 %v271_v14  ;;  %609 = vmatprep.mubr.bf16.mxu1 %v273_v15 }
 0x125   :  { %570 = vmatmul.mubr.bf16.vlgmr.msra.gmra.mrb[4].mxu0 %v270_v16  ;;  %610 = vmatmul.mubr.bf16.vlgmr.msra.gmra.mrb[4].mxu1 %v272_v13 }
 0x1f8   :  { %v707_v17 = vpop.f32.mrb[4].mxu0  ;;  %v729_v18 = vpop.f32.mrb[4].mxu1 }
 0x1f9   :  { %v708_v20 = vpop.f32.mrb[5].mxu0  ;;  %v730_v21 = vpop.f32.mrb[5].mxu1 }
 0x1fa   :  { %v709_v22 = vadd.f32 %v708_v20, %v707_v17  ;;  %v731_v23 = vadd.f32 %v730_v21, %v729_v18  ;;  %v710_v24 = vpop.f32.mrb[6].mxu0  ;;  %v732_v25 = vpop.f32.mrb[6].mxu1 }
 0x1fb   :  { %v711_v26 = vpop.f32.mrb[7].mxu0  ;;  %v733_v27 = vpop.f32.mrb[7].mxu1 }
 0x1fc   :  { %v572_v28 = vadd.f32 %v709_v22, %v658_v19 }
 0x1fe   :  { %v612_v29 = vadd.f32 %v731_v23, %v572_v28 }
 0x200   :  { %v617_v30 = vsub.f32 0.0, %v612_v29 }
 0x202   :  { %v618_v31 = vmul.f32 1.442695, %v617_v30 }
 0x204   :  { %800 = vpow2.f32 %v618_v31 }
 0x20e   :  { %v801_v32 = vpop.eup %800 }
 0x20f   :  { %v620_v33 = vadd.f32 1.0, %v801_v32 }
 0x211   :  { %802 = vrcp.f32 %v620_v33 }
 0x21b   :  { %v803_v34 = vpop.eup %802 }
 0x21c   :  { %v622_v35 = vpack.c.bf16 %v803_v34, %v803_v34 }
 0x21e   :  { %623 = vst [vmem:[#allocation8] sm:$0xf] %v622_v35 }
 0x21f   :  { %881 = shalt.err (!%p878_p0)
}
 0x220   :  { %s882_s12 = scalar_lea.hbm %s996_s5, 64 }
 0x221   :  { %p883_p1 = scmp.ne.s32.totalorder %s996_s5, %s882_s12  ;;  %p886_p2 = scmp.lt.u32.totalorder %s882_s12, %s996_s5 }
 0x223   :  { %p888_p3 = pnand %p886_p2, %p883_p1 }
 0x225   :  { %891 = shalt.err (!%p888_p3)
}
 0x226   :  { %633 = dma.vmem_to_hbm [thread:$0]  %s631_s9, 64, %s996_s5, [#allocation4]  }
 0x227   :  { %896 = dma.done.wait [#allocation4], 64  }
 0x228   :  { %897 = vsyncadd [#allocation4], 4294967232 }
 0x229   :  { %637 = vsyncpa [#allocation3], 1 }
 0x22a   :  { %638 = vsyncpa [#allocation6], 1 }
 0x22b   :  { %639 = vsyncpa [#allocation4], 1 }

</bundles_post_ra>
